<compile_context>
chip_gen: v5e
topology: v5e:2x2
jax: 0.10.0
libtpu: 0.0.40
codegen_flags: <defaults>
</compile_context>

<pallas_src>
import functools

import jax
import jax.numpy as jnp
from jax import lax
from jax.experimental import pallas as pl
from jax.experimental.pallas import tpu as pltpu

F32_MAX = float(jnp.finfo(jnp.float32).max)
NEG_BIG = jnp.float32(-1e30)   # large finite negative (not -inf) so softmax stays NaN-free


# ---------------------------------------------------------------- kernel -----

def _fused_masked_attention_kernel(x_ref, wT_ref, b_ref, bias_ref, o_ref, *,
                                   n_heads, head_dim, scale):
    # One batch element per grid step; all heads handled here so the stored output
    # block is a lane-dense (S, D) tile and no XLA-side head transpose is needed.
    D = n_heads * head_dim

    # ---- QKV projection: bf16 operands, f32 accumulation on the MXU ----
    qkv = jnp.dot(x_ref[...], wT_ref[...],
                  preferred_element_type=jnp.float32) + b_ref[...]        # (S, 3D) f32

    # Fold the softmax scale into q while still in f32 (no extra bf16 rounding),
    # then cast to bf16 for the attention matmuls.
    q = (qkv[:, 0 * D:1 * D] * scale).astype(jnp.bfloat16)
    k = qkv[:, 1 * D:2 * D].astype(jnp.bfloat16)
    v = qkv[:, 2 * D:3 * D].astype(jnp.bfloat16)

    bias = bias_ref[...]            # (1, S) f32 additive key-padding mask (0 / -1e30)

    hd = head_dim
    outs = []
    for h in range(n_heads):        # static loop; n_heads is small
        sl = slice(h * hd, (h + 1) * hd)
        # q @ k^T without materializing a transpose: contract the last dims of both.
        sim = lax.dot_general(q[:, sl], k[:, sl],
                              (((1,), (1,)), ((), ())),
                              preferred_element_type=jnp.float32)         # (S, S) f32
        sim = sim + bias                                                  # key-padding mask
        mx = jnp.max(sim, axis=-1, keepdims=True)
        p = jnp.exp(sim - mx)                                             # unnormalized probs
        l = jnp.sum(p, axis=-1, keepdims=True)                            # (S, 1)
        # PV matmul first, then normalize the small (S, hd) result (EUP reciprocal).
        o_h = jnp.dot(p.astype(v.dtype), v[:, sl],
                      preferred_element_type=jnp.float32)                 # (S, hd) f32
        outs.append(o_h * pl.reciprocal(l, approx=True))

    # Single store of the full (S, D) tile (avoids per-head narrow/masked partial stores).
    o_ref[...] = jnp.concatenate(outs, axis=-1).astype(o_ref.dtype)
    # TODO(synk): for long sequences, switch to a KV-blocked online-softmax (flash) grid
    # and a K-tiled QKV projection; the full (S, S) tile per head and the full (D, 3D)
    # weight tile here are only appropriate for short S / moderate D.


# ---------------------------------------------------------------- wrapper ----

class MaskedAttentionPallas:
    def __init__(self, dim, n_heads, causal=False, *, key):
        assert dim % n_heads == 0, "Dimensions must be divisible by number of heads"
        self.dim = dim
        self.n_heads = n_heads
        self.head_dim = dim // n_heads
        self.scale = self.head_dim ** (-0.5)
        self.causal = causal
        # TODO(synk): the reference's `causal` branch builds an (n_heads, seq) i>=j mask
        # that only broadcasts when n_heads == seq (buggy upstream); not reproduced here.

        # nn.Linear(dim, 3*dim) params, deterministic init (uniform like PyTorch default).
        k1, k2 = jax.random.split(key)
        bound = 1.0 / (dim ** 0.5)
        self.w = jax.random.uniform(k1, (3 * dim, dim), jnp.float32, -bound, bound)
        self.b = jax.random.uniform(k2, (3 * dim,), jnp.float32, -bound, bound)
        # MXU-friendly layouts prepared ONCE at init (not per call): bf16 W^T and 2-D bias.
        self.wT_bf16 = jnp.asarray(self.w.T, jnp.bfloat16)    # (D, 3D)
        self.b2 = self.b.reshape(1, 3 * dim)                  # (1, 3D) f32

    def __call__(self, x, mask=None):
        B, S, D = x.shape
        assert D == self.dim

        # Additive key-padding bias, built once per call (0 keep / -1e30 masked).
        if mask is None:
            bias = jnp.zeros((B, 1, S), jnp.float32)
        else:
            bias = jnp.where(mask.reshape(B, 1, S), 0.0, NEG_BIG).astype(jnp.float32)

        x_bf16 = x.astype(jnp.bfloat16)

        kernel = functools.partial(_fused_masked_attention_kernel,
                                   n_heads=self.n_heads, head_dim=self.head_dim,
                                   scale=self.scale)
        out = pl.pallas_call(
            kernel,
            out_shape=jax.ShapeDtypeStruct((B, S, D), jnp.float32),
            grid=(B,),
            in_specs=[
                pl.BlockSpec((None, S, D), lambda b: (b, 0, 0)),     # x rows for batch b
                pl.BlockSpec((D, 3 * D), lambda b: (0, 0)),          # W^T (resident)
                pl.BlockSpec((1, 3 * D), lambda b: (0, 0)),          # bias (resident)
                pl.BlockSpec((None, 1, S), lambda b: (b, 0, 0)),     # key-padding bias
            ],
            out_specs=pl.BlockSpec((None, S, D), lambda b: (b, 0, 0)),
            compiler_params=pltpu.CompilerParams(
                dimension_semantics=("parallel",),
                vmem_limit_bytes=32 * 1024 * 1024),
        )(x_bf16, self.wT_bf16, self.b2, bias)

        return out    # (B, S, D); no XLA-side transpose/reshape needed


# ----------------------------------------------------------- pure-JAX ref ----

def _ref_forward(x, w, b, n_heads, scale, mask):
    B, S, D = x.shape
    hd = D // n_heads
    qkv = x @ w.T + b
    q, k, v = jnp.split(qkv, 3, axis=-1)

    def to_h(t):
        return t.reshape(B, S, n_heads, hd).transpose(0, 2, 1, 3)

    q, k, v = map(to_h, (q, k, v))
    sim = jnp.einsum("bhqd,bhkd->bhqk", q, k) * scale
    if mask is not None:
        sim = jnp.where(mask[:, None, None, :], sim, -F32_MAX)
    attn = jax.nn.softmax(sim, axis=-1)
    out = jnp.einsum("bhqk,bhkd->bhqd", attn, v)
    return out.transpose(0, 2, 1, 3).reshape(B, S, D)


# --------------------------------------------------------------------- main --

if __name__ == "__main__":
    key = jax.random.PRNGKey(0)
    kx, kp = jax.random.split(key)

    B, S, dim, n_heads = 2, 8, 32, 4
    x = jax.random.normal(kx, (B, S, dim), jnp.float32)
    # boolean key-padding mask: batch 0 keeps all keys, batch 1 keeps first 5
    mask = jnp.arange(S)[None, :] < jnp.array([[S], [5]])

    attn = MaskedAttentionPallas(dim, n_heads, causal=False, key=kp)
    out = attn(x, mask)
    out = jax.block_until_ready(out)

    ref = _ref_forward(x, attn.w, attn.b, n_heads, attn.scale, mask)
    assert out.shape == (B, S, dim)
    # bf16 matmul inputs (f32 accumulation) -> loosened tolerance vs the pure-f32 reference
    assert jnp.allclose(out, ref, rtol=2e-2, atol=2e-2)

    print("KERNEL_OK")
</pallas_src>

<mosaic_0001>
module attributes {stable_mosaic.version = 11 : i64} {
  func.func @_fused_masked_attention_kernel(%arg0: i32, %arg1: memref<1x8x32xbf16, #tpu.memory_space<vmem>>, %arg2: memref<32x96xbf16, #tpu.memory_space<vmem>>, %arg3: memref<1x96xf32, #tpu.memory_space<vmem>>, %arg4: memref<1x1x8xf32, #tpu.memory_space<vmem>>, %arg5: memref<1x8x32xf32, #tpu.memory_space<vmem>>) attributes {dimension_semantics = [#tpu.dimension_semantics<parallel>], iteration_bounds = array<i64: 2>, scalar_prefetch = 0 : i64, scratch_operands = 0 : i64, tpu.core_type = #tpu.core_type<tc>, window_params = [{transform_indices = @transform_0, window_bounds = array<i64: 1, 8, 32>}, {pipeline_mode = #tpu.pipeline_mode<synchronous>, transform_indices = @transform_1, window_bounds = array<i64: 32, 96>}, {pipeline_mode = #tpu.pipeline_mode<synchronous>, transform_indices = @transform_2, window_bounds = array<i64: 1, 96>}, {transform_indices = @transform_3, window_bounds = array<i64: 1, 1, 8>}, {transform_indices = @transform_4, window_bounds = array<i64: 1, 8, 32>}]} {
    %c0 = arith.constant 0 : index
    %c0_0 = arith.constant 0 : index
    %c0_1 = arith.constant 0 : index
    %0 = vector.load %arg1[%c0, %c0_0, %c0_1] : memref<1x8x32xbf16, #tpu.memory_space<vmem>>, vector<1x8x32xbf16>
    %1 = vector.shape_cast %0 : vector<1x8x32xbf16> to vector<8x32xbf16>
    %c0_2 = arith.constant 0 : index
    %c0_3 = arith.constant 0 : index
    %2 = vector.load %arg2[%c0_2, %c0_3] : memref<32x96xbf16, #tpu.memory_space<vmem>>, vector<32x96xbf16>
    %cst = arith.constant dense<0.000000e+00> : vector<8x96xf32>
    %3 = tpu.matmul %1, %2, %cst {dimension_numbers = #tpu.dot_dimension_numbers<[1], [0], [0], [1], [0, 0, 1, 1], [], []>} : vector<8x32xbf16>, vector<32x96xbf16>, vector<8x96xf32> -> vector<8x96xf32>
    %c0_4 = arith.constant 0 : index
    %c0_5 = arith.constant 0 : index
    %4 = vector.load %arg3[%c0_4, %c0_5] : memref<1x96xf32, #tpu.memory_space<vmem>>, vector<1x96xf32>
    %5 = vector.broadcast %4 : vector<1x96xf32> to vector<8x96xf32>
    %6 = arith.addf %3, %5 : vector<8x96xf32>
    %7 = vector.extract_strided_slice %6 {offsets = [0, 0], sizes = [8, 32], strides = [1, 1]} : vector<8x96xf32> to vector<8x32xf32>
    %cst_6 = arith.constant 0.353553385 : f32
    %8 = vector.broadcast %cst_6 : f32 to vector<8x32xf32>
    %9 = arith.mulf %7, %8 : vector<8x32xf32>
    %10 = arith.truncf %9 : vector<8x32xf32> to vector<8x32xbf16>
    %11 = vector.extract_strided_slice %6 {offsets = [0, 32], sizes = [8, 32], strides = [1, 1]} : vector<8x96xf32> to vector<8x32xf32>
    %12 = arith.truncf %11 : vector<8x32xf32> to vector<8x32xbf16>
    %13 = vector.extract_strided_slice %6 {offsets = [0, 64], sizes = [8, 32], strides = [1, 1]} : vector<8x96xf32> to vector<8x32xf32>
    %14 = arith.truncf %13 : vector<8x32xf32> to vector<8x32xbf16>
    %c0_7 = arith.constant 0 : index
    %c0_8 = arith.constant 0 : index
    %c0_9 = arith.constant 0 : index
    %15 = vector.load %arg4[%c0_7, %c0_8, %c0_9] : memref<1x1x8xf32, #tpu.memory_space<vmem>>, vector<1x1x8xf32>
    %16 = vector.shape_cast %15 : vector<1x1x8xf32> to vector<1x8xf32>
    %17 = vector.extract_strided_slice %10 {offsets = [0, 0], sizes = [8, 8], strides = [1, 1]} : vector<8x32xbf16> to vector<8x8xbf16>
    %18 = vector.extract_strided_slice %12 {offsets = [0, 0], sizes = [8, 8], strides = [1, 1]} : vector<8x32xbf16> to vector<8x8xbf16>
    %cst_10 = arith.constant dense<0.000000e+00> : vector<8x8xf32>
    %19 = tpu.matmul %17, %18, %cst_10 {dimension_numbers = #tpu.dot_dimension_numbers<[1], [1], [0], [0], [0, 0, 1, 0], [], []>} : vector<8x8xbf16>, vector<8x8xbf16>, vector<8x8xf32> -> vector<8x8xf32>
    %20 = vector.broadcast %16 : vector<1x8xf32> to vector<8x8xf32>
    %21 = arith.addf %19, %20 : vector<8x8xf32>
    %cst_11 = arith.constant dense<0xFF800000> : vector<8xf32>
    %22 = vector.multi_reduction <maximumf>, %21, %cst_11 [1] : vector<8x8xf32> to vector<8xf32>
    %23 = vector.shape_cast %22 : vector<8xf32> to vector<8x1xf32>
    %24 = vector.broadcast %23 : vector<8x1xf32> to vector<8x8xf32>
    %25 = arith.subf %21, %24 : vector<8x8xf32>
    %26 = math.exp %25 : vector<8x8xf32>
    %cst_12 = arith.constant dense<0.000000e+00> : vector<8xf32>
    %27 = vector.multi_reduction <add>, %26, %cst_12 [1] : vector<8x8xf32> to vector<8xf32>
    %28 = vector.shape_cast %27 : vector<8xf32> to vector<8x1xf32>
    %29 = arith.truncf %26 : vector<8x8xf32> to vector<8x8xbf16>
    %30 = vector.extract_strided_slice %14 {offsets = [0, 0], sizes = [8, 8], strides = [1, 1]} : vector<8x32xbf16> to vector<8x8xbf16>
    %cst_13 = arith.constant dense<0.000000e+00> : vector<8x8xf32>
    %31 = tpu.matmul %29, %30, %cst_13 {dimension_numbers = #tpu.dot_dimension_numbers<[1], [0], [0], [1], [0, 0, 1, 1], [], []>} : vector<8x8xbf16>, vector<8x8xbf16>, vector<8x8xf32> -> vector<8x8xf32>
    %32 = tpu.reciprocal %28 {approx = true} : vector<8x1xf32> -> vector<8x1xf32>
    %33 = vector.broadcast %32 : vector<8x1xf32> to vector<8x8xf32>
    %34 = arith.mulf %31, %33 : vector<8x8xf32>
    %35 = vector.extract_strided_slice %10 {offsets = [0, 8], sizes = [8, 8], strides = [1, 1]} : vector<8x32xbf16> to vector<8x8xbf16>
    %36 = vector.extract_strided_slice %12 {offsets = [0, 8], sizes = [8, 8], strides = [1, 1]} : vector<8x32xbf16> to vector<8x8xbf16>
    %cst_14 = arith.constant dense<0.000000e+00> : vector<8x8xf32>
    %37 = tpu.matmul %35, %36, %cst_14 {dimension_numbers = #tpu.dot_dimension_numbers<[1], [1], [0], [0], [0, 0, 1, 0], [], []>} : vector<8x8xbf16>, vector<8x8xbf16>, vector<8x8xf32> -> vector<8x8xf32>
    %38 = vector.broadcast %16 : vector<1x8xf32> to vector<8x8xf32>
    %39 = arith.addf %37, %38 : vector<8x8xf32>
    %cst_15 = arith.constant dense<0xFF800000> : vector<8xf32>
    %40 = vector.multi_reduction <maximumf>, %39, %cst_15 [1] : vector<8x8xf32> to vector<8xf32>
    %41 = vector.shape_cast %40 : vector<8xf32> to vector<8x1xf32>
    %42 = vector.broadcast %41 : vector<8x1xf32> to vector<8x8xf32>
    %43 = arith.subf %39, %42 : vector<8x8xf32>
    %44 = math.exp %43 : vector<8x8xf32>
    %cst_16 = arith.constant dense<0.000000e+00> : vector<8xf32>
    %45 = vector.multi_reduction <add>, %44, %cst_16 [1] : vector<8x8xf32> to vector<8xf32>
    %46 = vector.shape_cast %45 : vector<8xf32> to vector<8x1xf32>
    %47 = arith.truncf %44 : vector<8x8xf32> to vector<8x8xbf16>
    %48 = vector.extract_strided_slice %14 {offsets = [0, 8], sizes = [8, 8], strides = [1, 1]} : vector<8x32xbf16> to vector<8x8xbf16>
    %cst_17 = arith.constant dense<0.000000e+00> : vector<8x8xf32>
    %49 = tpu.matmul %47, %48, %cst_17 {dimension_numbers = #tpu.dot_dimension_numbers<[1], [0], [0], [1], [0, 0, 1, 1], [], []>} : vector<8x8xbf16>, vector<8x8xbf16>, vector<8x8xf32> -> vector<8x8xf32>
    %50 = tpu.reciprocal %46 {approx = true} : vector<8x1xf32> -> vector<8x1xf32>
    %51 = vector.broadcast %50 : vector<8x1xf32> to vector<8x8xf32>
    %52 = arith.mulf %49, %51 : vector<8x8xf32>
    %53 = vector.extract_strided_slice %10 {offsets = [0, 16], sizes = [8, 8], strides = [1, 1]} : vector<8x32xbf16> to vector<8x8xbf16>
    %54 = vector.extract_strided_slice %12 {offsets = [0, 16], sizes = [8, 8], strides = [1, 1]} : vector<8x32xbf16> to vector<8x8xbf16>
    %cst_18 = arith.constant dense<0.000000e+00> : vector<8x8xf32>
    %55 = tpu.matmul %53, %54, %cst_18 {dimension_numbers = #tpu.dot_dimension_numbers<[1], [1], [0], [0], [0, 0, 1, 0], [], []>} : vector<8x8xbf16>, vector<8x8xbf16>, vector<8x8xf32> -> vector<8x8xf32>
    %56 = vector.broadcast %16 : vector<1x8xf32> to vector<8x8xf32>
    %57 = arith.addf %55, %56 : vector<8x8xf32>
    %cst_19 = arith.constant dense<0xFF800000> : vector<8xf32>
    %58 = vector.multi_reduction <maximumf>, %57, %cst_19 [1] : vector<8x8xf32> to vector<8xf32>
    %59 = vector.shape_cast %58 : vector<8xf32> to vector<8x1xf32>
    %60 = vector.broadcast %59 : vector<8x1xf32> to vector<8x8xf32>
    %61 = arith.subf %57, %60 : vector<8x8xf32>
    %62 = math.exp %61 : vector<8x8xf32>
    %cst_20 = arith.constant dense<0.000000e+00> : vector<8xf32>
    %63 = vector.multi_reduction <add>, %62, %cst_20 [1] : vector<8x8xf32> to vector<8xf32>
    %64 = vector.shape_cast %63 : vector<8xf32> to vector<8x1xf32>
    %65 = arith.truncf %62 : vector<8x8xf32> to vector<8x8xbf16>
    %66 = vector.extract_strided_slice %14 {offsets = [0, 16], sizes = [8, 8], strides = [1, 1]} : vector<8x32xbf16> to vector<8x8xbf16>
    %cst_21 = arith.constant dense<0.000000e+00> : vector<8x8xf32>
    %67 = tpu.matmul %65, %66, %cst_21 {dimension_numbers = #tpu.dot_dimension_numbers<[1], [0], [0], [1], [0, 0, 1, 1], [], []>} : vector<8x8xbf16>, vector<8x8xbf16>, vector<8x8xf32> -> vector<8x8xf32>
    %68 = tpu.reciprocal %64 {approx = true} : vector<8x1xf32> -> vector<8x1xf32>
    %69 = vector.broadcast %68 : vector<8x1xf32> to vector<8x8xf32>
    %70 = arith.mulf %67, %69 : vector<8x8xf32>
    %71 = vector.extract_strided_slice %10 {offsets = [0, 24], sizes = [8, 8], strides = [1, 1]} : vector<8x32xbf16> to vector<8x8xbf16>
    %72 = vector.extract_strided_slice %12 {offsets = [0, 24], sizes = [8, 8], strides = [1, 1]} : vector<8x32xbf16> to vector<8x8xbf16>
    %cst_22 = arith.constant dense<0.000000e+00> : vector<8x8xf32>
    %73 = tpu.matmul %71, %72, %cst_22 {dimension_numbers = #tpu.dot_dimension_numbers<[1], [1], [0], [0], [0, 0, 1, 0], [], []>} : vector<8x8xbf16>, vector<8x8xbf16>, vector<8x8xf32> -> vector<8x8xf32>
    %74 = vector.broadcast %16 : vector<1x8xf32> to vector<8x8xf32>
    %75 = arith.addf %73, %74 : vector<8x8xf32>
    %cst_23 = arith.constant dense<0xFF800000> : vector<8xf32>
    %76 = vector.multi_reduction <maximumf>, %75, %cst_23 [1] : vector<8x8xf32> to vector<8xf32>
    %77 = vector.shape_cast %76 : vector<8xf32> to vector<8x1xf32>
    %78 = vector.broadcast %77 : vector<8x1xf32> to vector<8x8xf32>
    %79 = arith.subf %75, %78 : vector<8x8xf32>
    %80 = math.exp %79 : vector<8x8xf32>
    %cst_24 = arith.constant dense<0.000000e+00> : vector<8xf32>
    %81 = vector.multi_reduction <add>, %80, %cst_24 [1] : vector<8x8xf32> to vector<8xf32>
    %82 = vector.shape_cast %81 : vector<8xf32> to vector<8x1xf32>
    %83 = arith.truncf %80 : vector<8x8xf32> to vector<8x8xbf16>
    %84 = vector.extract_strided_slice %14 {offsets = [0, 24], sizes = [8, 8], strides = [1, 1]} : vector<8x32xbf16> to vector<8x8xbf16>
    %cst_25 = arith.constant dense<0.000000e+00> : vector<8x8xf32>
    %85 = tpu.matmul %83, %84, %cst_25 {dimension_numbers = #tpu.dot_dimension_numbers<[1], [0], [0], [1], [0, 0, 1, 1], [], []>} : vector<8x8xbf16>, vector<8x8xbf16>, vector<8x8xf32> -> vector<8x8xf32>
    %86 = tpu.reciprocal %82 {approx = true} : vector<8x1xf32> -> vector<8x1xf32>
    %87 = vector.broadcast %86 : vector<8x1xf32> to vector<8x8xf32>
    %88 = arith.mulf %85, %87 : vector<8x8xf32>
    %89 = tpu.concatenate %34, %52, %70, %88 in 1 : vector<8x8xf32>, vector<8x8xf32>, vector<8x8xf32>, vector<8x8xf32> -> vector<8x32xf32>
    %c0_26 = arith.constant 0 : index
    %c0_27 = arith.constant 0 : index
    %c0_28 = arith.constant 0 : index
    %90 = vector.load %arg5[%c0_26, %c0_27, %c0_28] : memref<1x8x32xf32, #tpu.memory_space<vmem>>, vector<1x8x32xf32>
    %91 = vector.shape_cast %90 : vector<1x8x32xf32> to vector<8x32xf32>
    %92 = vector.shape_cast %89 : vector<8x32xf32> to vector<1x8x32xf32>
    tpu.vector_store %arg5[%c0_26, %c0_27, %c0_28], %92 {strides = array<i32>} : memref<1x8x32xf32, #tpu.memory_space<vmem>>, vector<1x8x32xf32>,
    return
  }
  func.func @transform_0(%arg0: i32) -> (i32, i32, i32) {
    %c0_i32 = arith.constant 0 : i32
    %c0_i32_0 = arith.constant 0 : i32
    %c0_i32_1 = arith.constant 0 : i32
    return %arg0, %c0_i32, %c0_i32_0 : i32, i32, i32
  }
  func.func @transform_1(%arg0: i32) -> (i32, i32) {
    %c0_i32 = arith.constant 0 : i32
    %c0_i32_0 = arith.constant 0 : i32
    %c0_i32_1 = arith.constant 0 : i32
    return %c0_i32, %c0_i32_0 : i32, i32
  }
  func.func @transform_2(%arg0: i32) -> (i32, i32) {
    %c0_i32 = arith.constant 0 : i32
    %c0_i32_0 = arith.constant 0 : i32
    %c0_i32_1 = arith.constant 0 : i32
    return %c0_i32, %c0_i32_0 : i32, i32
  }
  func.func @transform_3(%arg0: i32) -> (i32, i32, i32) {
    %c0_i32 = arith.constant 0 : i32
    %c0_i32_0 = arith.constant 0 : i32
    %c0_i32_1 = arith.constant 0 : i32
    return %arg0, %c0_i32, %c0_i32_0 : i32, i32, i32
  }
  func.func @transform_4(%arg0: i32) -> (i32, i32, i32) {
    %c0_i32 = arith.constant 0 : i32
    %c0_i32_0 = arith.constant 0 : i32
    %c0_i32_1 = arith.constant 0 : i32
    return %arg0, %c0_i32, %c0_i32_0 : i32, i32, i32
  }
}

</mosaic_0001>

<bundles_post_ra>
// kernel: tpu_custom_call.1
= control target key start
LH: loop header
LB: loop body
LE: loop exit
PB: predicated region body
PF: predicated region fallthrough
CT: control target
= control target key end

     0   :  { %9 = vsyncpa [#allocation3], 0  ;;  %s1200_s0 = inlined_call_operand.hbm [shape: bf16[2,8,32], index: 0, kind: input, shape index: {}]   ;;  %s1201_s1 = inlined_call_operand.hbm [shape: bf16[32,96], index: 1, kind: input, shape index: {}]   ;;  %s1202_s2 = inlined_call_operand.hbm [shape: f32[1,96], index: 2, kind: input, shape index: {}]   ;;  %s1203_s3 = inlined_call_operand.vmem [shape: f32[2,1,8], index: 3, kind: input, shape index: {}]   ;;  %s1204_s4 = inlined_call_operand.hbm [shape: f32[2,8,32], index: 4, kind: output, shape index: {}]  }
   0x1   :  { %11 = vsyncpa [#allocation3 + $0x1], 0 }
   0x2   :  { %12 = vsyncpa [#allocation6], 0 }
   0x3   :  { %13 = vsyncpa [#allocation4], 0 }
   0x4   :  { %15 = vsyncpa [#allocation4 + $0x1], 0  ;;  %s1009_s15 = smov 0   ;;  %s1011_s16 = smov 0  }
   0x5   :  { %s1013_s17 = smov 0   ;;  %s1015_s18 = smov 0  }
   0x6 LB: > { %s157_s21 = sshll.u32 %s1201_s1, 4  ;;  %s1033_s22 = sadd.s32 4294967295, %s964_s18   ;;  %s964_s18 = sphi %s1015_s18, %s1215_s18   ;;  %s960_s17 = sphi %s1013_s17, %s1214_s17   ;;  %s956_s16 = sphi %s1011_s16, %s1213_s16   ;;  %s952_s15 = sphi %s1009_s15, %s1212_s15   ;;  %s158_s21 = int_to_ptr.hbm [resolvable:$true] %s157_s21 }
   0x7   : > { %p669_p0 = scmp.ge.s32.totalorder %s964_s18, 1  ;;  %p42_p1 = scmp.eq.s32.totalorder %s1033_s22, 0 }
   0x8   : > { %p146_p2 = scmp.lt.s32.totalorder %s964_s18, 3  ;;  %s966_s24 = smov [#allocation5]  }
   0x9   : > { %s159_s25 = sshll.u32 %s966_s24, 4  ;;  %s172_s28 = sshll.u32 %s1202_s2, 4  ;;  %s160_s25 = int_to_ptr.vmem [resolvable:$true] %s159_s25  ;;  %s173_s28 = int_to_ptr.hbm [resolvable:$true] %s172_s28 }
   0xa   : > { %p1038_p3 = pnand %p669_p0, %p146_p2  ;;  %s967_s29 = smov [#allocation7]  }
   0xb   : > { %s174_s30 = sshll.u32 %s967_s29, 4  ;;  %s968_s5 = smov 64   ;;  %s175_s30 = int_to_ptr.vmem [resolvable:$true] %s174_s30 }
   0xc   : > { %p715_p4 = pneg %p1038_p3  ;;  %s969_s6 = smov 4  }
   0xd   : > { %s668_s7 = sadd.s32 4294967294, %s964_s18   ;;  %s1052_s8 = sadd.s32 1, %s964_s18  }
   0xe   : > { %p716_p6 = pnand %p715_p4, %p42_p1  ;;  %s25_s9 = ssub.s32 %s964_s18, %s1052_s8 }
   0xf   : > { %s28_s10 = sadd.s32 1, %s960_s17  ;;  %p26_p7 = scmp.eq.s32.totalorder %s25_s9, 0 }
  0x10   : > { %718 = dma.hbm_to_vmem [thread:$0]  (!%p716_p6), %s158_s21, 256, %s160_s25, [#allocation6], %s968_s5, %s968_s5, %s969_s6  }
  0x11   : > { %721 = dma.hbm_to_vmem [thread:$0]  (!%p716_p6), %s173_s28, 16, %s175_s30, [#allocation6]  }
  0x12   : > { %p35_p8 = scmp.ne.s32.totalorder %s960_s17, %s956_s16  ;;  %p36_p9 = scmp.eq.s32.totalorder %s964_s18, 0 }
  0x13   : > { %p41_p10 = scmp.ne.s32.totalorder %s956_s16, %s952_s15  ;;  %p133_p13 = scmp.eq.s32.totalorder %s1033_s22, 1 }
  0x14   : > { %s1063_s11 = scalar_select %p26_p7, %s960_s17, %s28_s10  }
  0x15   : > { %p1065_p11 = por %p36_p9, %p35_p8  ;;  %p1071_p12 = por %p42_p1, %p41_p10 }
  0x16   : > { %p139_p0 = scmp.eq.s32.totalorder %s668_s7, 1  ;;  %p732_p2 = scmp.lt.s32.totalorder %s964_s18, 2 }
  0x17   : > { %s185_s14 = sand.u32 1, %s960_s17   ;;  %p1078_p4 = por %p133_p13, %p35_p8 }
  0x18   : > { %p1082_p6 = por %p139_p0, %p41_p10  ;;  %s673_s21 = sshll.u32 %s185_s14, 2 }
  0x19   : > { %s674_s24 = sshll.u32 %s964_s18, 2  ;;  %s189_s28 = scalar_lea.vmem [#allocation2], %s673_s21 }
  0x1a   : > { %s193_s27 = scalar_lea.hbm %s1200_s0, %s674_s24  ;;  %s197_s29 = sshll.u32 %s189_s28, 4  ;;  %s198_s29 = int_to_ptr.vmem [resolvable:$true] %s197_s29 }
  0x1b   : > { %s195_s30 = sshll.u32 %s193_s27, 4  ;;  %p1092_p7 = pnand %p732_p2, %p1065_p11  ;;  %s196_s30 = int_to_ptr.hbm [resolvable:$true] %s195_s30 }
  0x1c   : > { %s186_s6 = scalar_lea.sflag [#allocation3], %s185_s14  ;;  %s864_s7 = sshra.s32 %s196_s30, 4  ;;  %s865_s7 = int_to_ptr.hbm [resolvable:$true] %s864_s7 }
  0x1d   : > { %s866_s9 = scalar_lea.hbm %s865_s7, 4  ;;  %p868_p9 = pneg %p1092_p7 }
  0x1e   : > { %p867_p8 = scmp.ne.s32.totalorder %s865_s7, %s866_s9  ;;  %s871_s24 = scalar_lea.hbm %s1200_s0, 8 }
  0x1f   : > { %p872_p11 = scmp.lt.s32.totalorder %s865_s7, %s1200_s0  ;;  %p873_p0 = scmp.lt.s32.totalorder %s871_s24, %s866_s9 }
  0x20   : > { %p869_p10 = pnand %p868_p9, %p867_p8 }
  0x21   : > { %p874_p2 = por %p873_p0, %p872_p11 }
  0x22   : > { %p870_p13 = pneg %p869_p10 }
  0x24   : > { %p875_p5 = pnand %p874_p2, %p870_p13 }
  0x26   : > { %878 = shalt.err (!%p875_p5)
}
  0x27   : > { %725 = dma.hbm_to_vmem [thread:$0]  (!%p1092_p7), %s196_s30, 64, %s198_s29, %s186_s6  }
  0x28   : > { %212 = sbr.rel (%p1038_p3) target bundleno = 856 (0x358), region = 36  ;;  %s1109_s14 = sand.u32 (!%p1038_p3), 1, %s956_s16  }
  0x29   : > { %s676_s26 = sshll.u32 (!%p1038_p3), %s1109_s14, 2  ;;  %s215_s27 = scalar_lea.sflag (!%p1038_p3), [#allocation3], %s1109_s14 }
  0x2a   : > { %s218_s28 = scalar_lea.vmem (!%p1038_p3), [#allocation2], %s676_s26 }
  0x2d   : > { %939 = dma.done.wait (%p1071_p12), %s215_s27, 64  }
  0x2e   : > { %941 = vsyncadd (%p1071_p12), %s215_s27, 4294967232 }
  0x2f   : > { %943 = dma.done.wait (%p42_p1), [#allocation6], 272  }
  0x30   : > { %945 = vsyncadd (%p42_p1), [#allocation6], 4294967024  ;;  %v702_v0 = vld [vmem:[#allocation5 + $0x8] sm:$0xff]  ;;  %v701_v1 = vld [vmem:[#allocation5] sm:$0xff]  ;;  %vm282_vm0 = vcmask 261120   ;;  %s970_s23 = smov 96  }
  0x31   : > { %292 = vmatpush.bf16.msra.mxu0 %v702_v0  ;;  %v261_v2 = vld [vmem:[%s218_s28] sm:$0xf]  ;;  %v786_v3 = vld [vmem:[#allocation7] ss:$0 sm:$0xff]  ;;  %s971_s13 = smov 104   ;;  %s972_s29 = smov 120  }
  0x32   : > { %s973_s30 = smov 88   ;;  %s974_s5 = smov 80   ;;  %vm311_vm1 = vcmask 64512   ;;  %vm346_vm2 = vcmask 1043456   ;;  %vm549_vm3 = vcmask 130048   ;;  %vm551_vm4 = vcmask 195584  }
  0x33   : > { %s975_s6 = smov 72   ;;  %s976_s7 = smov 112  }
  0x34   : > { %s977_s9 = smov 64   ;;  %p257_p1 = scmp.lt.s32.totalorder %s1033_s22, 1 }
  0x35   : > { %293 = vmatpush.bf16.msra.mxu0 %v701_v1  ;;  %s978_s12 = smov 56   ;;  %s979_s26 = smov 48  }
  0x36   : > { %s1131_s10 = scalar_select %p257_p1, %s1033_s22, 1 }
  0x37   : > { %s980_s27 = smov 40   ;;  %s981_s28 = smov 8  }
  0x38   : > { %688 = vmatmul.msk.bf16.vlgmr.msra.gmra.mxu0 %vm282_vm0, %v261_v2  ;;  %s259_s25 = scalar_lea.vmem %s1203_s3, %s1131_s10 }
  0x39   : > { %v787_v29 = vld [vmem:[%s259_s25] ss:$0 sm:$0xff] }
  0xb5   : > { %v295_v4 = vpop.f32.mrf.mxu0 }
  0xb6   : > { %v296_v5 = vadd.f32 %v786_v3, %v295_v4 }
  0xb8   : > { %v299_v6 = vmul.f32 0.35355338, %v296_v5  ;;  %v301_v7 = vpack.c.bf16 %v296_v5, %v296_v5 }
  0xba   : > { %v300_v8 = vpack.c.bf16 %v299_v6, %v299_v6  ;;  %v307_v9 = vunpack.c.l.b16 %v301_v7 }
  0xbc   : > { %v1122_v10 = vpack.c.b16 %v307_v9, %v307_v9  ;;  %v366_v11 = vunpack.c.l.b16 %v300_v8 }
  0xbd   : > { %v297_v12 = vpop.f32.mrf.mxu0 }
  0xbe   : > { %309 = vrot.lane.b32.xlu0 %v1122_v10, %s970_s23  ;;  %v367_v13 = vpack.c.b16 %v366_v11, %v366_v11  ;;  %s982_s23 = smov 16  }
  0xc0   : > { %480 = vrot.lane.b32.xlu2 %v367_v13, %s971_s13  ;;  %368 = vrot.lane.b32.xlu1 %v367_v13, %s972_s29  ;;  %s983_s13 = smov 24   ;;  %s679_s29 = sshll.u32 %s1109_s14, 3 }
  0xc6   : > { %370 = vrot.lane.b32.xlu0 %v1122_v10, %s973_s30  ;;  %s698_s30 = sshll.u32 %s1033_s22, 3  ;;  %s555_s22 = scalar_lea.sflag [#allocation4], %s1109_s14 }
  0xc8   : > { %426 = vrot.lane.b32.xlu2 %v1122_v10, %s974_s5  ;;  %482 = vrot.lane.b32.xlu1 %v1122_v10, %s975_s6 }
  0xce   : > { %424 = vrot.lane.b32.xlu0 %v367_v13, %s976_s7  ;;  %s565_s7 = scalar_lea.hbm %s1204_s4, %s698_s30 }
  0xcf   : > { %s569_s21 = sshll.u32 %s565_s7, 4  ;;  %s570_s21 = int_to_ptr.hbm [resolvable:$true] %s569_s21 }
  0xd0   : > { %341 = vrot.lane.b32.xlu2 %v1122_v10, %s977_s9  ;;  %s256_s9 = scalar_lea.vmem [#allocation8], %s679_s29  ;;  %s908_s24 = sshra.s32 %s570_s21, 4  ;;  %s909_s24 = int_to_ptr.hbm [resolvable:$true] %s908_s24 }
  0xd1   : > { %s567_s10 = sshll.u32 %s256_s9, 4  ;;  %s910_s25 = scalar_lea.hbm %s909_s24, 8  ;;  %s568_s10 = int_to_ptr.vmem [resolvable:$true] %s567_s10 }
  0xd2   : > { %p911_p3 = scmp.ne.s32.totalorder %s909_s24, %s910_s25  ;;  %p915_p7 = scmp.lt.s32.totalorder %s909_s24, %s1204_s4 }
  0xd4   : > { %p912_p5 = pnand %p911_p3, %p1078_p4 }
  0xd6   : > { %p913_p12 = pneg %p912_p5 }
  0xd8   : > { %401 = vrot.lane.b32.xlu2 %v1122_v10, %s978_s12 }
 0x11a   : > { %v481_v14 = vpop.permute.xlu2 %480 }
 0x122   : > { %v427_v15 = vpop.permute.xlu2 %426 }
 0x123   : > { %v432_v16 = vsel %vm311_vm1, %v427_v15, 0 }
 0x124   : > { %441 = vmatpush.bf16.xpose.msrb.mxu0 %v432_v16 }
 0x12a   : > { %v342_v17 = vpop.permute.xlu2 %341 }
 0x12b   : > { %v348_v18 = vsel %vm346_vm2, %v342_v17, 0 }
 0x12c   : > { %357 = vmatpush.bf16.msra.mxu2 %v348_v18 }
 0x130   : > { %v310_v19 = vpop.permute.xlu0 %309 }
 0x131   : > { %v316_v20 = vsel %vm311_vm1, %v310_v19, 0 }
 0x132   : > { %325 = vmatpush.bf16.xpose.msra.mxu1 %v316_v20  ;;  %v402_v21 = vpop.permute.xlu2 %401  ;;  %v369_v22 = vpop.permute.xlu1 %368 }
 0x133   : > { %v407_v23 = vsel %vm346_vm2, %v402_v21, 0 }
 0x134   : > { %416 = vmatpush.bf16.msrb.mxu2 %v407_v23 }
 0x138   : > { %v371_v24 = vpop.permute.xlu0 %370 }
 0x139   : > { %689 = vmatmul.msk.bf16.vlgmr.msra.gmra.mxu1 %vm311_vm1, %v300_v8  ;;  %v376_v25 = vsel %vm311_vm1, %v371_v24, 0 }
 0x13a   : > { %385 = vmatpush.bf16.xpose.msra.mxu3 %v376_v25  ;;  %v483_v26 = vpop.permute.xlu1 %482 }
 0x13b   : > { %v488_v27 = vsel %vm311_vm1, %v483_v26, 0 }
 0x140   : > { %v425_v28 = vpop.permute.xlu0 %424 }
 0x141   : > { %691 = vmatmul.msk.bf16.vlgmr.msra.gmra.mxu3 %vm311_vm1, %v369_v22  ;;  %693 = vmatmul.msk.bf16.vlgmr.msrb.gmra.mxu0 %vm311_vm1, %v425_v28 }
 0x142   : > { %497 = vmatpush.bf16.xpose.msrb.mxu3 %v488_v27 }
 0x151   : > { %695 = vmatmul.msk.bf16.vlgmr.msrb.gmra.mxu3 %vm311_vm1, %v481_v14 }
 0x1b6   : > { %v327_v30 = vpop.f32.mrf.mxu1 }
 0x1b7   : > { %v328_v31 = vadd.f32 %v787_v29, %v327_v30 }
 0x1b9   : > { %v331_v32 = vsel %vm311_vm1, %v328_v31, -inf }
 0x1ba   : > { %332 = vmax.xlane.f32.xlu1 %v331_v32 }
 0x1be   : > { %v329_v33 = vpop.f32.mrf.mxu1  ;;  %v443_v34 = vpop.f32.mrf.mxu0 }
 0x1bf   : > { %v444_v35 = vadd.f32 %v787_v29, %v443_v34 }
 0x1c1   : > { %v447_v36 = vsel %vm311_vm1, %v444_v35, -inf }
 0x1c2   : > { %448 = vmax.xlane.f32.xlu1 %v447_v36 }
 0x1c4   : > { %v387_v37 = vpop.f32.mrf.mxu3 }
 0x1c5   : > { %v388_v38 = vadd.f32 %v787_v29, %v387_v37 }
 0x1c6   : > { %v445_v39 = vpop.f32.mrf.mxu0 }
 0x1c7   : > { %v391_v40 = vsel %vm311_vm1, %v388_v38, -inf }
 0x1c8   : > { %392 = vmax.xlane.f32.xlu0 %v391_v40 }
 0x1cc   : > { %v389_v41 = vpop.f32.mrf.mxu3 }
 0x1d4   : > { %v499_v42 = vpop.f32.mrf.mxu3 }
 0x1d5   : > { %v500_v43 = vadd.f32 %v787_v29, %v499_v42 }
 0x1d7   : > { %v503_v44 = vsel %vm311_vm1, %v500_v43, -inf }
 0x1d8   : > { %504 = vmax.xlane.f32.xlu2 %v503_v44 }
 0x1db   : > { %457 = vrot.lane.b32.xlu1 %v1122_v10, %s979_s26 }
 0x1dc   : > { %513 = vrot.lane.b32.xlu0 %v1122_v10, %s980_s27  ;;  %v501_v45 = vpop.f32.mrf.mxu3  ;;  %s914_s27 = scalar_lea.hbm %s1204_s4, 16 }
 0x1dd   : > { %p916_p8 = scmp.lt.s32.totalorder %s914_s27, %s910_s25 }
 0x1df   : > { %p917_p9 = por %p916_p8, %p915_p7 }
 0x1e1   : > { %p918_p10 = pnand %p917_p9, %p913_p12 }
 0x22d   : > { %v333_v46 = vpop.xlane.xlu1 %332 }
 0x22e   : > { %v334_v47 = vsub.f32 %v328_v31, %v333_v46 }
 0x230   : > { %v335_v48 = vmul.f32 1.442695, %v334_v47 }
 0x232   : > { %788 = vpow2.f32 %v335_v48 }
 0x235   : > { %v449_v51 = vpop.xlane.xlu1 %448 }
 0x236   : > { %v450_v54 = vsub.f32 %v444_v35, %v449_v51 }
 0x238   : > { %v789_v49 = vpop.eup %788  ;;  %v451_v56 = vmul.f32 1.442695, %v450_v54 }
 0x239   : > { %v340_v50 = vpack.c.bf16 %v789_v49, %v789_v49  ;;  %v337_v8 = vsel %vm311_vm1, %v789_v49, 0.0 }
 0x23b   : > { %v393_v52 = vpop.xlane.xlu0 %392  ;;  %690 = vmatmul.msk.bf16.vlgmr.msra.gmra.mxu2 %vm311_vm1, %v340_v50 }
 0x23c   : > { %v394_v53 = vsub.f32 %v388_v38, %v393_v52 }
 0x23e   : > { %v395_v55 = vmul.f32 1.442695, %v394_v53 }
 0x240   : > { %790 = vpow2.f32 %v395_v55 }
 0x241   : > { %792 = vpow2.f32 %v451_v56 }
 0x246   : > { %v791_v57 = vpop.eup %790 }
 0x247   : > { %v397_v58 = vsel %vm311_vm1, %v791_v57, 0.0  ;;  %v400_v59 = vpack.c.bf16 %v791_v57, %v791_v57  ;;  %v793_v61 = vpop.eup %792 }
 0x248   : > { %398 = vadd.xlane.f32.xlu2 %v397_v58  ;;  %v453_v4 = vsel %vm311_vm1, %v793_v61, 0.0  ;;  %v456_v5 = vpack.c.bf16 %v793_v61, %v793_v61 }
 0x24b   : > { %v505_v60 = vpop.xlane.xlu2 %504  ;;  %692 = vmatmul.msk.bf16.vlgmr.msrb.gmra.mxu2 %vm311_vm1, %v400_v59 }
 0x24c   : > { %v506_v62 = vsub.f32 %v500_v43, %v505_v60 }
 0x24d   : > { %v458_v63 = vpop.permute.xlu1 %457 }
 0x24e   : > { %v507_v0 = vmul.f32 1.442695, %v506_v62  ;;  %v514_v1 = vpop.permute.xlu0 %513  ;;  %v463_v2 = vsel %vm346_vm2, %v458_v63, 0 }
 0x24f   : > { %v519_v3 = vsel %vm346_vm2, %v514_v1, 0  ;;  %472 = vmatpush.bf16.msrb.mxu1 %v463_v2 }
 0x250   : > { %794 = vpow2.f32 %v507_v0  ;;  %528 = vmatpush.bf16.msra.mxu2 %v519_v3  ;;  %454 = vadd.xlane.f32.xlu2 %v453_v4 }
 0x252   : > { %694 = vmatmul.msk.bf16.vlgmr.msrb.gmra.mxu1 %vm311_vm1, %v456_v5 }
 0x256   : > { %v795_v6 = vpop.eup %794 }
 0x257   : > { %v509_v7 = vsel %vm311_vm1, %v795_v6, 0.0  ;;  %v512_v9 = vpack.c.bf16 %v795_v6, %v795_v6 }
 0x258   : > { %510 = vadd.xlane.f32.xlu0 %v509_v7  ;;  %338 = vadd.xlane.f32.xlu2 %v337_v8 }
 0x25b   : > { %696 = vmatmul.msk.bf16.vlgmr.msra.gmra.mxu2 %vm311_vm1, %v512_v9 }
 0x2bb   : > { %v399_v10 = vpop.xlane.xlu2 %398 }
 0x2bc   : > { %796 = vrcp.f32 %v399_v10 }
 0x2be   : > { %v359_v11 = vpop.f32.mrf.mxu2 }
 0x2c2   : > { %v797_v14 = vpop.eup %796 }
 0x2c3   : > { %v455_v12 = vpop.xlane.xlu2 %454 }
 0x2c4   : > { %798 = vrcp.f32 %v455_v12 }
 0x2c6   : > { %v361_v13 = vpop.f32.mrf.mxu2 }
 0x2ca   : > { %v799_v16 = vpop.eup %798 }
 0x2cb   : > { %v511_v20 = vpop.xlane.xlu0 %510  ;;  %v339_v27 = vpop.xlane.xlu2 %338 }
 0x2cc   : > { %800 = vrcp.f32 %v511_v20 }
 0x2cd   : > { %802 = vrcp.f32 %v339_v27 }
 0x2ce   : > { %v418_v15 = vpop.f32.mrf.mxu2 }
 0x2cf   : > { %v423_v17 = vmul.f32 %v797_v14, %v418_v15  ;;  %v474_v18 = vpop.f32.mrf.mxu1 }
 0x2d0   : > { %v479_v19 = vmul.f32 %v799_v16, %v474_v18 }
 0x2d1   : > { %537 = vrot.lane.b32.xlu1 %v423_v17, %s981_s28 }
 0x2d2   : > { %541 = vrot.lane.b32.xlu2 %v479_v19, %s982_s23  ;;  %v801_v23 = vpop.eup %800 }
 0x2d3   : > { %v803_v28 = vpop.eup %802 }
 0x2d4   : > { %v364_v30 = vmul.f32 %v803_v28, %v359_v11 }
 0x2d6   : > { %v420_v21 = vpop.f32.mrf.mxu2 }
 0x2d7   : > { %v476_v22 = vpop.f32.mrf.mxu1 }
 0x2de   : > { %v530_v24 = vpop.f32.mrf.mxu2 }
 0x2df   : > { %v535_v25 = vmul.f32 %v801_v23, %v530_v24 }
 0x2e1   : > { %545 = vrot.lane.b32.xlu1 %v535_v25, %s983_s13 }
 0x2e6   : > { %v532_v26 = vpop.f32.mrf.mxu2 }
 0x32c   : > { %v542_v32 = vpop.permute.xlu2 %541 }
 0x343   : > { %v538_v29 = vpop.permute.xlu1 %537 }
 0x344   : > { %v548_v31 = vsel %vm311_vm1, %v364_v30, %v538_v29 }
 0x345   : > { %v550_v33 = vsel %vm549_vm3, %v548_v31, %v542_v32 }
 0x353   : > { %v546_v34 = vpop.permute.xlu1 %545 }
 0x354   : > { %v552_v35 = vsel %vm551_vm4, %v550_v33, %v546_v34 }
 0x355   : > { %553 = vst.msk [vmem:[%s256_s9] sm:$0xff] %vm282_vm0, %v552_v35 }
 0x356   : > { %921 = shalt.err (!%p918_p10)
}
 0x357   : > { %713 = dma.vmem_to_hbm [thread:$0]  (%p1078_p4), %s568_s10, 128, %s570_s21, %s555_s22  }
 0x358 PF: > { %s581_s14 = sand.u32 1, %s952_s15   ;;  %p1211_p13 = scmp.ge.s32.totalorder %s964_s18, 2 }
 0x359   : > { %s582_s13 = scalar_lea.sflag [#allocation4], %s581_s14 }
 0x35a   : > { %p727_p11 = pnand %p1211_p13, %p1082_p6 }
 0x35c   : > { %p728_p0 = pneg %p727_p11 }
 0x35e   : > { %947 = dma.done.wait (%p728_p0), %s582_s13, 128  }
 0x35f   : > { %949 = vsyncadd (%p728_p0), %s582_s13, 4294967168  ;;  %p18_p2 = scmp.ge.s32.totalorder %s1052_s8, 4   ;;  %s1212_s15 = smov %s956_s16 }
 0x360   : > { %s1213_s16 = smov %s960_s17  ;;  %s1214_s17 = smov %s1063_s11 }
 0x361   : > { %s1215_s18 = smov %s1052_s8  ;;  %20 = sbr.rel (!%p18_p2) target bundleno = 6 (0x6), region = 92 }
 0x366   :  { %588 = vsyncpa [#allocation3], 1 }
 0x367   :  { %590 = vsyncpa [#allocation3 + $0x1], 1 }
 0x368   :  { %591 = vsyncpa [#allocation6], 1 }
 0x369   :  { %592 = vsyncpa [#allocation4], 1 }
 0x36a   :  { %594 = vsyncpa [#allocation4 + $0x1], 1 }

</bundles_post_ra>
